<compile_context>
chip_gen: v7x
topology: tpu7x:2x2x1
jax: 0.10.0
libtpu: 0.0.40
codegen_flags: <defaults>
</compile_context>

<pallas_src>
import functools

import jax
import jax.numpy as jnp
from jax import lax
from jax.experimental import pallas as pl
from jax.experimental.pallas import tpu as pltpu


# ----------------------------------------------------------------------------
# Fused dispatch -> expert MLP -> combine kernel
#
#   x_e      = disp_e @ tok                      (C, H)   [dispatch einsum]
#   h1       = relu(x_e @ w1[:, f-tile] + b1)    (C, tF)
#   y_e     += h1 @ w2[f-tile, :]                (C, H)   [accumulated over F tiles]
#   contrib  = disp_e^T @ (y_e + b2)             (T, H)   [combine einsum]
#   out_acc += contrib ;  out = gate * out_acc at the last expert of the shard
#
# Grid = (G, expert_shard, expert_in_shard, F_tile); the output block is resident
# across the two inner ("arbitrary") axes.
# ----------------------------------------------------------------------------
def moe_kernel(tok_ref, disp_ref, gate_ref, w1_ref, b1_ref, w2_ref, b2_ref,
               out_ref, x_sc, y_sc, acc_sc):
    e = pl.program_id(2)
    f = pl.program_id(3)
    n_e = pl.num_programs(2)
    n_f = pl.num_programs(3)

    disp = disp_ref[0, 0]                 # (C, T) bf16, lane-dense (T last)
    tok = tok_ref[0]                      # (T, H) bf16

    # Dispatch matmul only once per expert (first F tile).  The mask is one-hot,
    # so storing the f32 MXU result straight into the bf16 scratch is exact.
    # NOTE: when n_f == 1 every pl.when region below fires in the same grid step;
    # they are traced in program order (x_sc write -> FFN -> y_sc init -> finalize),
    # which keeps that case correct.
    @pl.when(f == 0)
    def _():
        x_sc[...] = jnp.dot(disp, tok,
                            preferred_element_type=jnp.float32).astype(jnp.bfloat16)

    x_e = x_sc[...]                                                    # (C, H) bf16

    w1 = w1_ref[0]                        # (H, tF) bf16
    b1 = b1_ref[0]                        # (1, tF) f32
    h1 = jnp.maximum(
        jnp.dot(x_e, w1, preferred_element_type=jnp.float32) + b1, 0.0)  # (C, tF) f32
    part = jnp.dot(h1.astype(jnp.bfloat16), w2_ref[0],
                   preferred_element_type=jnp.float32)                   # (C, H) f32

    @pl.when(f == 0)
    def _():
        y_sc[...] = part

    @pl.when(f > 0)
    def _():
        y_sc[...] += part

    # Last F tile of this expert: finish the FFN, combine, accumulate the output.
    @pl.when(f == n_f - 1)
    def _():
        y_e = (y_sc[...] + b2_ref[0]).astype(jnp.bfloat16)               # (C, H)
        # combine: contrib[t, h] = sum_c disp[c, t] * y_e[c, h]
        # (contract dim 0 of both operands -> transposed-LHS MXU matmul, the
        #  (C, T) mask stays lane-dense, no XLU relayout)
        contrib = lax.dot_general(
            disp, y_e, dimension_numbers=(((0,), (0,)), ((), ())),
            preferred_element_type=jnp.float32)                          # (T, H) f32

        @pl.when(e == 0)
        def _():
            acc_sc[...] = contrib        # no zero-fill pass

        @pl.when(e > 0)
        def _():
            acc_sc[...] += contrib

        @pl.when(e == n_e - 1)
        def _():
            # combine_array = gate * dispatch  =>  apply the gate once at the end.
            out_ref[0, 0] = (gate_ref[0] * acc_sc[...]).astype(out_ref.dtype)


# ----------------------------------------------------------------------------
# Generation-aware VMEM planning
# ----------------------------------------------------------------------------
def _tpu_vmem_capacity():
    # v5e/v6e: 128 MiB; v7x: 64 MiB per TensorCore.
    try:
        return int(pltpu.get_tpu_info().vmem_capacity_bytes)
    except Exception:
        return 64 << 20      # conservative fallback (v7x per-TC)


def _vmem_plan(T, H, C, F, out_itemsize):
    """Largest VMEM-fitting 128-aligned F tile + scoped-VMEM limit for this chip."""
    cap = _tpu_vmem_capacity()
    bf, f32 = 2, 4
    # f_tile-independent, double-buffered input/output blocks.
    fixed = 2 * (T * H * bf            # tokens
                 + C * T * bf          # dispatch mask
                 + T * f32             # gate
                 + H * f32             # b2
                 + T * H * out_itemsize)   # output block
    # Single-buffered scratch: x_sc (bf16), y_sc (f32), acc_sc (f32).
    fixed += C * H * bf + C * H * f32 + T * H * f32
    # Bytes per F element of the double-buffered w1 / b1 / w2 tiles.
    per_f = 2 * (H * bf + f32 + H * bf)

    budget = int(cap * 0.85) - int(fixed * 1.3) - (2 << 20)
    if budget >= per_f * F:
        f_tile = F
    else:
        f_tile = None
        t = max(budget // per_f, 128)
        t = (t // 128) * 128
        while t >= 128:
            if F % t == 0:
                f_tile = t
                break
            t -= 128
        if f_tile is None:
            # F has no 128-aligned divisor -> cannot tile (BlockSpec constraint).
            f_tile = F

    est = int((fixed + per_f * f_tile) * 1.3) + (4 << 20)
    vmem_limit = min(max(est, 32 << 20), int(cap * 0.9))
    return f_tile, vmem_limit


def _default_expert_shards(num_groups):
    """Expert sharding only pays on 2-TensorCore chips (v7x) with no group parallelism."""
    try:
        kind = jax.devices()[0].device_kind.lower()
    except Exception:
        kind = ""
    two_tensorcores = ("v7" in kind) or ("7x" in kind)
    return 2 if (two_tensorcores and num_groups < 2) else 1


def moe_dispatch_compute_combine(tokens_bf, disp_bf, gate, w1, b1, w2, b2,
                                 *, num_expert_shards=1, f_tile=None):
    G, T, H = tokens_bf.shape
    E, _, F = w1.shape
    C = disp_bf.shape[2]

    if num_expert_shards < 1 or E % num_expert_shards != 0:
        num_expert_shards = 1
    e_per_shard = E // num_expert_shards

    # bf16 per-shard partials halve HBM writeback when shards > 1 (wrapper sums in
    # f32); single-shard output stays f32.
    out_dtype = jnp.bfloat16 if num_expert_shards > 1 else jnp.float32

    auto_f_tile, vmem_limit = _vmem_plan(T, H, C, F, jnp.dtype(out_dtype).itemsize)
    if f_tile is None:
        f_tile = auto_f_tile
    n_f = F // f_tile

    # global expert index = shard * e_per_shard + local expert index
    tok_map = lambda g, p, e, f: (g, 0, 0)
    disp_map = lambda g, p, e, f: (g, p * e_per_shard + e, 0, 0)
    gate_map = lambda g, p, e, f: (g, 0, 0)
    w1_map = lambda g, p, e, f: (p * e_per_shard + e, 0, f)
    b1_map = lambda g, p, e, f: (p * e_per_shard + e, 0, f)
    w2_map = lambda g, p, e, f: (p * e_per_shard + e, f, 0)
    b2_map = lambda g, p, e, f: (p * e_per_shard + e, 0, 0)
    out_map = lambda g, p, e, f: (g, p, 0, 0)

    return pl.pallas_call(
        moe_kernel,
        out_shape=jax.ShapeDtypeStruct((G, num_expert_shards, T, H), out_dtype),
        grid_spec=pltpu.PrefetchScalarGridSpec(
            num_scalar_prefetch=0,
            grid=(G, num_expert_shards, e_per_shard, n_f),
            in_specs=[
                pl.BlockSpec((1, T, H), tok_map),          # tokens   (bf16)
                pl.BlockSpec((1, 1, C, T), disp_map),      # dispatch (bf16, lane-dense)
                pl.BlockSpec((1, T, 1), gate_map),         # gate     (f32)
                pl.BlockSpec((1, H, f_tile), w1_map),      # w1 tile  (bf16)
                pl.BlockSpec((1, 1, f_tile), b1_map),      # b1 tile  (f32)
                pl.BlockSpec((1, f_tile, H), w2_map),      # w2 tile  (bf16)
                pl.BlockSpec((1, 1, H), b2_map),           # b2       (f32)
            ],
            out_specs=pl.BlockSpec((1, 1, T, H), out_map),
            scratch_shapes=[
                pltpu.VMEM((C, H), jnp.bfloat16),          # x_e cache (one-hot -> exact)
                pltpu.VMEM((C, H), jnp.float32),           # y_e accumulator (F tiles)
                pltpu.VMEM((T, H), jnp.float32),           # output accumulator (experts)
            ]),
        compiler_params=pltpu.CompilerParams(
            dimension_semantics=("parallel", "parallel", "arbitrary", "arbitrary"),
            vmem_limit_bytes=vmem_limit),
    )(tokens_bf, disp_bf, gate, w1, b1, w2, b2)


# ----------------------------------------------------------------------------
# Router + tokens-choose-top-1 routing glue (plain JAX: with small E the logits
# tile is lane-sparse and a dedicated pallas_call is latency-bound).
# ----------------------------------------------------------------------------
def router_probs(tokens, w_router):
    logits = jnp.einsum("gth,he->gte", tokens.astype(jnp.float32),
                        w_router.astype(jnp.float32))
    return jax.nn.softmax(logits, axis=-1)


def tokens_choose_top1_routing(probs, num_experts, capacity, *,
                               capacity_pad=None, mask_dtype=jnp.bfloat16):
    """Returns (dispatch_mask (G,E,Cp,T) mask_dtype, gate (G,T,1) f32).

    combine_array == gate * dispatch_mask, so only the dispatch mask + gate are
    materialized.  The keep/drop decision uses the *logical* capacity; slots in
    [capacity, capacity_pad) are never assigned, so padding only aligns the MXU
    M dimension.  Ties break toward the lower token index (cumsum priority,
    matching T5X); tokens over capacity are silently dropped (mask zeroed).
    """
    G, T, E = probs.shape
    C = capacity if capacity_pad is None else capacity_pad
    expert_idx = jnp.argmax(probs, axis=-1)                        # (G, T)
    expert_gate = jnp.max(probs, axis=-1)                          # (G, T)
    expert_mask = jax.nn.one_hot(expert_idx, num_experts,
                                 dtype=jnp.float32)                # (G, T, E)
    position_in_expert = jnp.cumsum(expert_mask, axis=1) * expert_mask - 1.0
    pos_tok = jnp.max(position_in_expert, axis=-1)                 # (G, T) >= 0
    keep = pos_tok < capacity                                      # (G, T) bool
    pos_tok = jnp.clip(pos_tok, 0, capacity - 1).astype(jnp.int32)

    # Dispatch mask built directly in bf16, expert-major, lane-dense (G, E, C, T).
    e_hot = expert_idx[:, None, :] == jnp.arange(num_experts)[None, :, None]   # (G,E,T)
    c_hot = pos_tok[:, None, :] == jnp.arange(C)[None, :, None]                # (G,C,T)
    dispatch_ect = (e_hot[:, :, None, :] & c_hot[:, None, :, :]
                    & keep[:, None, None, :]).astype(mask_dtype)               # (G,E,C,T)
    gate = (expert_gate * keep.astype(jnp.float32))[..., None]                 # (G,T,1)
    return dispatch_ect, gate


def _pad_capacity(capacity):
    # MXU-friendly padding of the slot (M) dimension of both FFN matmuls; padded
    # slots never receive a token, so forward semantics are unchanged.
    # TODO(synk): round to 256 on v6e/v7x (2x256 MXU) for very large capacities.
    m = 128 if capacity >= 128 else 8
    return ((capacity + m - 1) // m) * m


def maybe_pad(inputs, num_groups):
    # Mirrors MoeLayer._maybe_pad; with num_groups == 1 it is always a no-op.
    batch, seq = inputs.shape[:2]
    if (batch * seq) % num_groups == 0:
        return inputs
    # TODO(synk): multi-group padding search not needed for the single-device case.
    return inputs


# ----------------------------------------------------------------------------
# MoeLayer forward
# ----------------------------------------------------------------------------
def moe_layer_forward(inputs, params, *, num_experts, num_groups=1,
                      capacity_factor=1.0, min_expert_capacity=4,
                      num_expert_shards=None):
    # inputs: (batch, seq, hidden)
    B, S, H = inputs.shape
    padded = maybe_pad(inputs, num_groups)
    pB, pS = padded.shape[:2]
    num_tokens = pB * pS
    tokens_per_group = num_tokens // num_groups
    expert_capacity = max(
        int(round(capacity_factor * tokens_per_group / num_experts)),
        min_expert_capacity)
    capacity_pad = _pad_capacity(expert_capacity)

    tokens = padded.reshape(num_groups, tokens_per_group, H)

    probs = router_probs(tokens, params["w_router"])
    dispatch_ect, gate = tokens_choose_top1_routing(
        probs, num_experts, expert_capacity,
        capacity_pad=capacity_pad, mask_dtype=jnp.bfloat16)

    if num_expert_shards is None:
        num_expert_shards = _default_expert_shards(num_groups)

    # TODO(synk): _AllToAll is the identity for world_size == 1; a multi-device
    # version would interleave pltpu.make_async_remote_copy with the expert FFN.
    partials = moe_dispatch_compute_combine(
        tokens.astype(jnp.bfloat16),
        dispatch_ect,
        gate,
        params["w1"].astype(jnp.bfloat16), params["b1"],
        params["w2"].astype(jnp.bfloat16), params["b2"],
        num_expert_shards=num_expert_shards)

    if partials.shape[1] == 1:
        combined = partials[:, 0].astype(jnp.float32)         # no shard reduction
    else:
        combined = jnp.sum(partials.astype(jnp.float32), axis=1)
    result = combined.reshape(pB, pS, H)
    return result[:B, :S]


# ----------------------------------------------------------------------------
# Pure-JAX f32 reference (mirrors the torch einsum semantics) for verification.
# ----------------------------------------------------------------------------
def reference_forward(inputs, params, *, num_experts, capacity_factor=1.0,
                      min_expert_capacity=4):
    B, S, H = inputs.shape
    tokens = inputs.reshape(1, B * S, H)
    T = B * S
    capacity = max(int(round(capacity_factor * T / num_experts)),
                   min_expert_capacity)
    logits = jnp.einsum("gth,he->gte", tokens, params["w_router"])
    probs = jax.nn.softmax(logits, axis=-1)
    disp, gate = tokens_choose_top1_routing(probs, num_experts, capacity,
                                            mask_dtype=jnp.float32)
    # dispatch: expert_inputs[g,e,c,h] = sum_t disp[g,e,c,t] * tokens[g,t,h]
    x = jnp.einsum("gect,gth->gech", disp, tokens)[0]               # (E, C, H)
    h1 = jnp.maximum(
        jnp.einsum("ech,ehf->ecf", x, params["w1"]) + params["b1"], 0.0)
    y = jnp.einsum("ecf,efh->ech", h1, params["w2"]) + params["b2"]
    combined = jnp.einsum("gech,gect->gth", y[None], disp) * gate   # (G, T, H)
    return combined.reshape(B, S, H)


# ----------------------------------------------------------------------------
if __name__ == "__main__":
    B, S, H = 2, 8, 32           # batch, seq, hidden
    E, F = 4, 64                 # num (local) experts, expert FFN width
    num_groups = 1               # world_size == 1

    key = jax.random.PRNGKey(0)
    k_in, k_r, k_w1, k_b1, k_w2, k_b2 = jax.random.split(key, 6)

    x = jax.random.normal(k_in, (B, S, H), dtype=jnp.float32)

    params = {
        "w_router": jax.random.normal(k_r, (H, E), dtype=jnp.float32) * 0.1,
        "w1": jax.random.normal(k_w1, (E, H, F), dtype=jnp.float32) * 0.05,
        "b1": jax.random.normal(k_b1, (E, 1, F), dtype=jnp.float32) * 0.01,
        "w2": jax.random.normal(k_w2, (E, F, H), dtype=jnp.float32) * 0.05,
        "b2": jax.random.normal(k_b2, (E, 1, H), dtype=jnp.float32) * 0.01,
    }

    fwd = jax.jit(functools.partial(
        moe_layer_forward, num_experts=E, num_groups=num_groups,
        capacity_factor=1.0, min_expert_capacity=4, num_expert_shards=None))

    out = jax.block_until_ready(fwd(x, params))

    ref = reference_forward(x, params, num_experts=E, capacity_factor=1.0,
                            min_expert_capacity=4)
    assert out.shape == (B, S, H), out.shape
    # Kernel uses bf16 MXU operands with f32 accumulation; reference is pure f32.
    assert jnp.allclose(out, ref, atol=3e-2, rtol=3e-2), "mismatch vs reference"

    print("KERNEL_OK")
</pallas_src>

<mosaic_0001>
module attributes {stable_mosaic.version = 11 : i64} {
  func.func @moe_kernel(%arg0: i32, %arg1: i32, %arg2: i32, %arg3: i32, %arg4: memref<1x16x32xbf16, #tpu.memory_space<vmem>>, %arg5: memref<1x1x8x16xbf16, #tpu.memory_space<vmem>>, %arg6: memref<1x16x1xf32, #tpu.memory_space<vmem>>, %arg7: memref<1x32x64xbf16, #tpu.memory_space<vmem>>, %arg8: memref<1x1x64xf32, #tpu.memory_space<vmem>>, %arg9: memref<1x64x32xbf16, #tpu.memory_space<vmem>>, %arg10: memref<1x1x32xf32, #tpu.memory_space<vmem>>, %arg11: memref<1x1x16x32xf32, #tpu.memory_space<vmem>>, %arg12: memref<8x32xbf16, #tpu.memory_space<vmem>>, %arg13: memref<8x32xf32, #tpu.memory_space<vmem>>, %arg14: memref<16x32xf32, #tpu.memory_space<vmem>>) attributes {dimension_semantics = [#tpu.dimension_semantics<parallel>, #tpu.dimension_semantics<parallel>, #tpu.dimension_semantics<arbitrary>, #tpu.dimension_semantics<arbitrary>], iteration_bounds = array<i64: 1, 1, 4, 1>, scalar_prefetch = 0 : i64, scratch_operands = 3 : i64, tpu.core_type = #tpu.core_type<tc>, window_params = [{transform_indices = @transform_0, window_bounds = array<i64: 1, 16, 32>}, {transform_indices = @transform_1, window_bounds = array<i64: 1, 1, 8, 16>}, {transform_indices = @transform_2, window_bounds = array<i64: 1, 16, 1>}, {transform_indices = @transform_3, window_bounds = array<i64: 1, 32, 64>}, {transform_indices = @transform_4, window_bounds = array<i64: 1, 1, 64>}, {transform_indices = @transform_5, window_bounds = array<i64: 1, 64, 32>}, {transform_indices = @transform_6, window_bounds = array<i64: 1, 1, 32>}, {transform_indices = @transform_7, window_bounds = array<i64: 1, 1, 16, 32>}]} {
    %c0 = arith.constant 0 : index
    %c0_0 = arith.constant 0 : index
    %c0_1 = arith.constant 0 : index
    %c0_2 = arith.constant 0 : index
    %0 = vector.load %arg5[%c0, %c0_0, %c0_1, %c0_2] : memref<1x1x8x16xbf16, #tpu.memory_space<vmem>>, vector<1x1x8x16xbf16>
    %1 = vector.shape_cast %0 : vector<1x1x8x16xbf16> to vector<8x16xbf16>
    %c0_3 = arith.constant 0 : index
    %c0_4 = arith.constant 0 : index
    %c0_5 = arith.constant 0 : index
    %2 = vector.load %arg4[%c0_3, %c0_4, %c0_5] : memref<1x16x32xbf16, #tpu.memory_space<vmem>>, vector<1x16x32xbf16>
    %3 = vector.shape_cast %2 : vector<1x16x32xbf16> to vector<16x32xbf16>
    %c0_i32 = arith.constant 0 : i32
    %4 = arith.cmpi eq, %arg3, %c0_i32 : i32
    %5 = arith.extui %4 : i1 to i32
    %c0_i32_6 = arith.constant 0 : i32
    %6 = arith.cmpi ne, %5, %c0_i32_6 : i32
    scf.if %6 {
      %cst_26 = arith.constant dense<0.000000e+00> : vector<8x32xf32>
      %30 = tpu.matmul %1, %3, %cst_26 {dimension_numbers = #tpu.dot_dimension_numbers<[1], [0], [0], [1], [0, 0, 1, 1], [], []>} : vector<8x16xbf16>, vector<16x32xbf16>, vector<8x32xf32> -> vector<8x32xf32>
      %31 = arith.truncf %30 : vector<8x32xf32> to vector<8x32xbf16>
      %c0_27 = arith.constant 0 : index
      %c0_28 = arith.constant 0 : index
      %32 = vector.load %arg12[%c0_27, %c0_28] : memref<8x32xbf16, #tpu.memory_space<vmem>>, vector<8x32xbf16>
      tpu.vector_store %arg12[%c0_27, %c0_28], %31 {strides = array<i32>} : memref<8x32xbf16, #tpu.memory_space<vmem>>, vector<8x32xbf16>,
    } else {
    }
    %c0_7 = arith.constant 0 : index
    %c0_8 = arith.constant 0 : index
    %7 = vector.load %arg12[%c0_7, %c0_8] : memref<8x32xbf16, #tpu.memory_space<vmem>>, vector<8x32xbf16>
    %c0_9 = arith.constant 0 : index
    %c0_10 = arith.constant 0 : index
    %c0_11 = arith.constant 0 : index
    %8 = vector.load %arg7[%c0_9, %c0_10, %c0_11] : memref<1x32x64xbf16, #tpu.memory_space<vmem>>, vector<1x32x64xbf16>
    %9 = vector.shape_cast %8 : vector<1x32x64xbf16> to vector<32x64xbf16>
    %c0_12 = arith.constant 0 : index
    %c0_13 = arith.constant 0 : index
    %c0_14 = arith.constant 0 : index
    %10 = vector.load %arg8[%c0_12, %c0_13, %c0_14] : memref<1x1x64xf32, #tpu.memory_space<vmem>>, vector<1x1x64xf32>
    %11 = vector.shape_cast %10 : vector<1x1x64xf32> to vector<1x64xf32>
    %cst = arith.constant dense<0.000000e+00> : vector<8x64xf32>
    %12 = tpu.matmul %7, %9, %cst {dimension_numbers = #tpu.dot_dimension_numbers<[1], [0], [0], [1], [0, 0, 1, 1], [], []>} : vector<8x32xbf16>, vector<32x64xbf16>, vector<8x64xf32> -> vector<8x64xf32>
    %13 = vector.broadcast %11 : vector<1x64xf32> to vector<8x64xf32>
    %14 = arith.addf %12, %13 : vector<8x64xf32>
    %cst_15 = arith.constant 0.000000e+00 : f32
    %15 = vector.broadcast %cst_15 : f32 to vector<8x64xf32>
    %16 = arith.maximumf %14, %15 : vector<8x64xf32>
    %17 = arith.truncf %16 : vector<8x64xf32> to vector<8x64xbf16>
    %c0_16 = arith.constant 0 : index
    %c0_17 = arith.constant 0 : index
    %c0_18 = arith.constant 0 : index
    %18 = vector.load %arg9[%c0_16, %c0_17, %c0_18] : memref<1x64x32xbf16, #tpu.memory_space<vmem>>, vector<1x64x32xbf16>
    %19 = vector.shape_cast %18 : vector<1x64x32xbf16> to vector<64x32xbf16>
    %cst_19 = arith.constant dense<0.000000e+00> : vector<8x32xf32>
    %20 = tpu.matmul %17, %19, %cst_19 {dimension_numbers = #tpu.dot_dimension_numbers<[1], [0], [0], [1], [0, 0, 1, 1], [], []>} : vector<8x64xbf16>, vector<64x32xbf16>, vector<8x32xf32> -> vector<8x32xf32>
    %c0_i32_20 = arith.constant 0 : i32
    %21 = arith.cmpi eq, %arg3, %c0_i32_20 : i32
    %22 = arith.extui %21 : i1 to i32
    %c0_i32_21 = arith.constant 0 : i32
    %23 = arith.cmpi ne, %22, %c0_i32_21 : i32
    scf.if %23 {
      %c0_26 = arith.constant 0 : index
      %c0_27 = arith.constant 0 : index
      %30 = vector.load %arg13[%c0_26, %c0_27] : memref<8x32xf32, #tpu.memory_space<vmem>>, vector<8x32xf32>
      tpu.vector_store %arg13[%c0_26, %c0_27], %20 {strides = array<i32>} : memref<8x32xf32, #tpu.memory_space<vmem>>, vector<8x32xf32>,
    } else {
    }
    %c0_i32_22 = arith.constant 0 : i32
    %24 = arith.cmpi sgt, %arg3, %c0_i32_22 : i32
    %25 = arith.extui %24 : i1 to i32
    %c0_i32_23 = arith.constant 0 : i32
    %26 = arith.cmpi ne, %25, %c0_i32_23 : i32
    scf.if %26 {
      %c0_26 = arith.constant 0 : index
      %c0_27 = arith.constant 0 : index
      %30 = vector.load %arg13[%c0_26, %c0_27] : memref<8x32xf32, #tpu.memory_space<vmem>>, vector<8x32xf32>
      %31 = arith.addf %30, %20 : vector<8x32xf32>
      %c0_28 = arith.constant 0 : index
      %c0_29 = arith.constant 0 : index
      %32 = vector.load %arg13[%c0_28, %c0_29] : memref<8x32xf32, #tpu.memory_space<vmem>>, vector<8x32xf32>
      tpu.vector_store %arg13[%c0_28, %c0_29], %31 {strides = array<i32>} : memref<8x32xf32, #tpu.memory_space<vmem>>, vector<8x32xf32>,
    } else {
    }
    %c0_i32_24 = arith.constant 0 : i32
    %27 = arith.cmpi eq, %arg3, %c0_i32_24 : i32
    %28 = arith.extui %27 : i1 to i32
    %c0_i32_25 = arith.constant 0 : i32
    %29 = arith.cmpi ne, %28, %c0_i32_25 : i32
    scf.if %29 {
      %c0_26 = arith.constant 0 : index
      %c0_27 = arith.constant 0 : index
      %30 = vector.load %arg13[%c0_26, %c0_27] : memref<8x32xf32, #tpu.memory_space<vmem>>, vector<8x32xf32>
      %c0_28 = arith.constant 0 : index
      %c0_29 = arith.constant 0 : index
      %c0_30 = arith.constant 0 : index
      %31 = vector.load %arg10[%c0_28, %c0_29, %c0_30] : memref<1x1x32xf32, #tpu.memory_space<vmem>>, vector<1x1x32xf32>
      %32 = vector.shape_cast %31 : vector<1x1x32xf32> to vector<1x32xf32>
      %33 = vector.broadcast %32 : vector<1x32xf32> to vector<8x32xf32>
      %34 = arith.addf %30, %33 : vector<8x32xf32>
      %35 = arith.truncf %34 : vector<8x32xf32> to vector<8x32xbf16>
      %cst_31 = arith.constant dense<0.000000e+00> : vector<16x32xf32>
      %36 = tpu.matmul %1, %35, %cst_31 {dimension_numbers = #tpu.dot_dimension_numbers<[0], [0], [1], [1], [0, 1, 1, 1], [], []>} : vector<8x16xbf16>, vector<8x32xbf16>, vector<16x32xf32> -> vector<16x32xf32>
      %c0_i32_32 = arith.constant 0 : i32
      %37 = arith.cmpi eq, %arg2, %c0_i32_32 : i32
      %38 = arith.extui %37 : i1 to i32
      %c0_i32_33 = arith.constant 0 : i32
      %39 = arith.cmpi ne, %38, %c0_i32_33 : i32
      scf.if %39 {
        %c0_37 = arith.constant 0 : index
        %c0_38 = arith.constant 0 : index
        %46 = vector.load %arg14[%c0_37, %c0_38] : memref<16x32xf32, #tpu.memory_space<vmem>>, vector<16x32xf32>
        tpu.vector_store %arg14[%c0_37, %c0_38], %36 {strides = array<i32>} : memref<16x32xf32, #tpu.memory_space<vmem>>, vector<16x32xf32>,
      } else {
      }
      %c0_i32_34 = arith.constant 0 : i32
      %40 = arith.cmpi sgt, %arg2, %c0_i32_34 : i32
      %41 = arith.extui %40 : i1 to i32
      %c0_i32_35 = arith.constant 0 : i32
      %42 = arith.cmpi ne, %41, %c0_i32_35 : i32
      scf.if %42 {
        %c0_37 = arith.constant 0 : index
        %c0_38 = arith.constant 0 : index
        %46 = vector.load %arg14[%c0_37, %c0_38] : memref<16x32xf32, #tpu.memory_space<vmem>>, vector<16x32xf32>
        %47 = arith.addf %46, %36 : vector<16x32xf32>
        %c0_39 = arith.constant 0 : index
        %c0_40 = arith.constant 0 : index
        %48 = vector.load %arg14[%c0_39, %c0_40] : memref<16x32xf32, #tpu.memory_space<vmem>>, vector<16x32xf32>
        tpu.vector_store %arg14[%c0_39, %c0_40], %47 {strides = array<i32>} : memref<16x32xf32, #tpu.memory_space<vmem>>, vector<16x32xf32>,
      } else {
      }
      %c3_i32 = arith.constant 3 : i32
      %43 = arith.cmpi eq, %arg2, %c3_i32 : i32
      %44 = arith.extui %43 : i1 to i32
      %c0_i32_36 = arith.constant 0 : i32
      %45 = arith.cmpi ne, %44, %c0_i32_36 : i32
      scf.if %45 {
        %c0_37 = arith.constant 0 : index
        %c0_38 = arith.constant 0 : index
        %c0_39 = arith.constant 0 : index
        %46 = vector.load %arg6[%c0_37, %c0_38, %c0_39] : memref<1x16x1xf32, #tpu.memory_space<vmem>>, vector<1x16x1xf32>
        %47 = vector.shape_cast %46 : vector<1x16x1xf32> to vector<16x1xf32>
        %c0_40 = arith.constant 0 : index
        %c0_41 = arith.constant 0 : index
        %48 = vector.load %arg14[%c0_40, %c0_41] : memref<16x32xf32, #tpu.memory_space<vmem>>, vector<16x32xf32>
        %49 = vector.broadcast %47 : vector<16x1xf32> to vector<16x32xf32>
        %50 = arith.mulf %49, %48 : vector<16x32xf32>
        %c0_42 = arith.constant 0 : index
        %c0_43 = arith.constant 0 : index
        %c0_44 = arith.constant 0 : index
        %c0_45 = arith.constant 0 : index
        %51 = vector.load %arg11[%c0_42, %c0_43, %c0_44, %c0_45] : memref<1x1x16x32xf32, #tpu.memory_space<vmem>>, vector<1x1x16x32xf32>
        %52 = vector.shape_cast %51 : vector<1x1x16x32xf32> to vector<16x32xf32>
        %53 = vector.shape_cast %50 : vector<16x32xf32> to vector<1x1x16x32xf32>
        tpu.vector_store %arg11[%c0_42, %c0_43, %c0_44, %c0_45], %53 {strides = array<i32>} : memref<1x1x16x32xf32, #tpu.memory_space<vmem>>, vector<1x1x16x32xf32>,
      } else {
      }
    } else {
    }
    return
  }
  func.func @transform_0(%arg0: i32, %arg1: i32, %arg2: i32, %arg3: i32) -> (i32, i32, i32) {
    %c0_i32 = arith.constant 0 : i32
    %c0_i32_0 = arith.constant 0 : i32
    %c0_i32_1 = arith.constant 0 : i32
    return %arg0, %c0_i32, %c0_i32_0 : i32, i32, i32
  }
  func.func @transform_1(%arg0: i32, %arg1: i32, %arg2: i32, %arg3: i32) -> (i32, i32, i32, i32) {
    %c4_i32 = arith.constant 4 : i32
    %0 = arith.muli %arg1, %c4_i32 : i32
    %1 = arith.addi %0, %arg2 : i32
    %c0_i32 = arith.constant 0 : i32
    %c0_i32_0 = arith.constant 0 : i32
    %c0_i32_1 = arith.constant 0 : i32
    return %arg0, %1, %c0_i32, %c0_i32_0 : i32, i32, i32, i32
  }
  func.func @transform_2(%arg0: i32, %arg1: i32, %arg2: i32, %arg3: i32) -> (i32, i32, i32) {
    %c0_i32 = arith.constant 0 : i32
    %c0_i32_0 = arith.constant 0 : i32
    %c0_i32_1 = arith.constant 0 : i32
    return %arg0, %c0_i32, %c0_i32_0 : i32, i32, i32
  }
  func.func @transform_3(%arg0: i32, %arg1: i32, %arg2: i32, %arg3: i32) -> (i32, i32, i32) {
    %c4_i32 = arith.constant 4 : i32
    %0 = arith.muli %arg1, %c4_i32 : i32
    %1 = arith.addi %0, %arg2 : i32
    %c0_i32 = arith.constant 0 : i32
    %c0_i32_0 = arith.constant 0 : i32
    return %1, %c0_i32, %arg3 : i32, i32, i32
  }
  func.func @transform_4(%arg0: i32, %arg1: i32, %arg2: i32, %arg3: i32) -> (i32, i32, i32) {
    %c4_i32 = arith.constant 4 : i32
    %0 = arith.muli %arg1, %c4_i32 : i32
    %1 = arith.addi %0, %arg2 : i32
    %c0_i32 = arith.constant 0 : i32
    %c0_i32_0 = arith.constant 0 : i32
    return %1, %c0_i32, %arg3 : i32, i32, i32
  }
  func.func @transform_5(%arg0: i32, %arg1: i32, %arg2: i32, %arg3: i32) -> (i32, i32, i32) {
    %c4_i32 = arith.constant 4 : i32
    %0 = arith.muli %arg1, %c4_i32 : i32
    %1 = arith.addi %0, %arg2 : i32
    %c0_i32 = arith.constant 0 : i32
    %c0_i32_0 = arith.constant 0 : i32
    return %1, %arg3, %c0_i32 : i32, i32, i32
  }
  func.func @transform_6(%arg0: i32, %arg1: i32, %arg2: i32, %arg3: i32) -> (i32, i32, i32) {
    %c4_i32 = arith.constant 4 : i32
    %0 = arith.muli %arg1, %c4_i32 : i32
    %1 = arith.addi %0, %arg2 : i32
    %c0_i32 = arith.constant 0 : i32
    %c0_i32_0 = arith.constant 0 : i32
    %c0_i32_1 = arith.constant 0 : i32
    return %1, %c0_i32, %c0_i32_0 : i32, i32, i32
  }
  func.func @transform_7(%arg0: i32, %arg1: i32, %arg2: i32, %arg3: i32) -> (i32, i32, i32, i32) {
    %c0_i32 = arith.constant 0 : i32
    %c0_i32_0 = arith.constant 0 : i32
    %c0_i32_1 = arith.constant 0 : i32
    return %arg0, %arg1, %c0_i32, %c0_i32_0 : i32, i32, i32, i32
  }
}

</mosaic_0001>

<bundles_post_ra>
// kernel: moe_layer_forward.1
= control target key start
LH: loop header
LB: loop body
LE: loop exit
PB: predicated region body
PF: predicated region fallthrough
CT: control target
= control target key end

     0   :  { %12 = vsyncpa [#allocation6], 0  ;;  %s1247_s24 = smov 0   ;;  %s1249_s25 = smov 0   ;;  %s1353_s0 = inlined_call_operand.vmem [shape: bf16[1,16,32], index: 0, kind: input, shape index: {}]   ;;  %s1354_s1 = inlined_call_operand.vmem [shape: bf16[1,4,8,16], index: 1, kind: input, shape index: {}]   ;;  %s1355_s2 = inlined_call_operand.vmem [shape: f32[1,16,1], index: 2, kind: input, shape index: {}]   ;;  %s1356_s3 = inlined_call_operand.vmem [shape: bf16[4,32,64], index: 3, kind: input, shape index: {}]   ;;  %s1357_s4 = inlined_call_operand.vmem [shape: f32[4,1,64], index: 4, kind: input, shape index: {}]   ;;  %s1358_s5 = inlined_call_operand.vmem [shape: bf16[4,64,32], index: 5, kind: input, shape index: {}]   ;;  %s1359_s6 = inlined_call_operand.vmem [shape: f32[4,1,32], index: 6, kind: input, shape index: {}]   ;;  %s1360_s7 = inlined_call_operand.hbm [shape: f32[1,1,16,32], index: 7, kind: output, shape index: {}]  }
   0x1   :  { %s1251_s26 = smov 0  }
   0x2 LB: > { %s1025_s27 = sadd.s32 4294967295, %s1199_s26   ;;  %s36_s28 = sadd.s32 1, %s1195_s25  ;;  %s1199_s26 = sphi %s1251_s26, %s18_s26   ;;  %s1195_s25 = sphi %s1249_s25, %s1363_s25   ;;  %s1191_s24 = sphi %s1247_s24, %s1362_s24  }
   0x3   : > { %p38_p0 = scmp.ge.s32.totalorder %s36_s28, 4  ;;  %p1030_p1 = scmp.ge.s32.totalorder %s1199_s26, 1 }
   0x4   : > { %p384_p2 = scmp.lt.s32.totalorder %s1199_s26, 5 }
   0x5   : > { %s1365_s28 = smov (%p38_p0, %s36_s28), 0 }
   0x6   : > { %p385_p3 = pnand %p1030_p1, %p384_p2 }
   0x7   : > { %v1139_v0 = vld [vmem:[%s1353_s0] sm:$0xff] (!%p385_p3)   ;;  %v1201_v1 = vmov (!%p385_p3), 0.0   ;;  %p469_p4 = scmp.lt.s32.totalorder (!%p385_p3), %s1191_s24, 3  ;;  %vm1202_vm0 = vmmov (!%p385_p3), 0   ;;  %vm539_vm1 = vcmask (!%p385_p3), 130048   ;;  %vm584_vm2 = vcmask (!%p385_p3), 257024  }
   0x8   : > { %388 = sbr.rel (%p385_p3) target bundleno = 1077 (0x435), region = 48  ;;  %1070 = vmatprep.subr.bf16.mxu0 (!%p385_p3), %v1201_v1  ;;  %1076 = vmatprep.subr.bf16.mxu1 (!%p385_p3), %v1201_v1  ;;  %vm610_vm3 = vcmask (!%p385_p3), 261120   ;;  %vm688_vm4 = vcmask (!%p385_p3), 523264   ;;  %vm776_vm5 = vcmask (!%p385_p3), 1043456   ;;  %vm772_vm6 = vcmask (!%p385_p3), 64512   ;;  %p1049_p5 = scmp.ne.s32.totalorder (!%p385_p3), %s1191_s24, 0 }
   0x9   : > { %1071 = vmatpush3.bf16.msra.mxu0 (!%p385_p3), %v1139_v0  ;;  %1072 = vmatprep.mubr.msk.bf16.mxu0 (!%p385_p3), %vm1202_vm0, %v1201_v1 }
   0xa   : > { %1080 = vmatprep.mubr.msk.bf16.mxu1 (!%p385_p3), %vm1202_vm0, %v1201_v1  ;;  %1084 = vmatprep.subr.bf16.mxu0 (!%p385_p3), %v1201_v1 }
   0xf   : > { %s1274_s8 = scalar_select %p469_p4, %s1191_s24, 3 }
  0x11   : > { %s1031_s9 = sshll.u32 %s1274_s8, 2  ;;  %s1056_s13 = sshll.u32 %s1274_s8, 4 }
  0x12   : > { %s474_s12 = scalar_lea.vmem %s1354_s1, %s1031_s9  ;;  %s491_s16 = scalar_lea.vmem %s1356_s3, %s1056_s13 }
  0x13   : > { %v526_v2 = vld [vmem:[%s474_s12] sm:$0xf]  ;;  %v1141_v4 = vld [vmem:[%s491_s16 + $0x8] sm:$0xff]   ;;  %s1057_s17 = sshll.u32 %s1274_s8, 5  ;;  %s501_s23 = scalar_lea.vmem %s1357_s4, %s1274_s8 }
  0x14   : > { %1073 = vmatmul.mubr.msk.bf16.vlgmr.msra.gmra.mrb[0].mxu0 %vm539_vm1, %v526_v2  ;;  %756 = vxpose.xlu0.c.b16.start.end [1/1] (short) (narrow) %v526_v2, 16  ;;  %v1140_v3 = vld [vmem:[%s491_s16] sm:$0xff]   ;;  %s514_s20 = scalar_lea.vmem %s1358_s5, %s1057_s17  ;;  %s522_s9 = scalar_lea.vmem %s1359_s6, %s1274_s8 }
  0x15   : > { %1092 = vmatprep.mubr.msk.bf16.mxu0 %vm1202_vm0, %v1201_v1  ;;  %1077 = vmatpush3.bf16.msra.mxu1 %v1140_v3  ;;  %v1142_v5 = vld [vmem:[%s514_s20] sm:$0xff]   ;;  %v1143_v6 = vld [vmem:[%s514_s20 + $0x8] sm:$0xff]   ;;  %v1144_v13 = vld [vmem:[%s514_s20 + $0x10] sm:$0xff]  }
  0x16   : > { %1078 = vmatprep.subr.bf16.mxu1 %v1201_v1  ;;  %1085 = vmatpush3.bf16.msra.mxu0 %v1142_v5  ;;  %v1145_v14 = vld [vmem:[%s514_s20 + $0x18] sm:$0xff]   ;;  %v1038_v15 = vld [vmem:[%s501_s23] ss:$0 sm:$0xff] }
  0x17   : > { %1086 = vmatprep.subr.bf16.mxu0 %v1201_v1  ;;  %v1047_v27 = vld [vmem:[%s522_s9] ss:$0 sm:$0xff] }
  0x19   : > { %1079 = vmatpush3.bf16.msra.mxu1 %v1141_v4 }
  0x1a   : > { %1096 = vmatprep.subr.bf16.mxu1 %v1201_v1  ;;  %1087 = vmatpush3.bf16.msra.mxu0 %v1143_v6 }
  0x1b   : > { %1088 = vmatprep.subr.bf16.mxu0 %v1201_v1 }
  0x1e   : > { %1089 = vmatpush3.bf16.msra.mxu0 %v1144_v13 }
  0x1f   : > { %1090 = vmatprep.subr.bf16.mxu0 %v1201_v1 }
  0x22   : > { %1091 = vmatpush3.bf16.msra.mxu0 %v1145_v14 }
  0x7a   : > { %v764_v32 = vpop.trf.xlu0 }
  0xe7   : > { %v577_v7 = vpop.f32.mrb[0].mxu0 }
  0xe8   : > { %v583_v8 = vpack.c.bf16 %v577_v7, %v577_v7  ;;  %v1074_v9 = vpop.f32.mrb[1].mxu0 }
  0xe9   : > { %v580_v10 = vpop.f32.mrb[2].mxu0 }
  0xea   : > { %585 = vst.msk [vmem:[#allocation2] sm:$0xf] %vm584_vm2, %v583_v8  ;;  %v1075_v11 = vpop.f32.mrb[3].mxu0 }
  0xf1   : > { %v586_v12 = vld [vmem:[#allocation2] sm:$0xf] }
  0xf2   : > { %1081 = vmatmul.mubr.msk.bf16.vlgmr.msra.gmra.mrb[0].mxu1 %vm610_vm3, %v586_v12 }
  0xf3   : > { %1098 = vmatprep.mubr.msk.bf16.mxu1 %vm1202_vm0, %v1201_v1 }
 0x1c5   : > { %v648_v16 = vpop.f32.mrb[0].mxu1 }
 0x1c6   : > { %v649_v17 = vadd.f32 %v1038_v15, %v648_v16  ;;  %v1082_v18 = vpop.f32.mrb[1].mxu1 }
 0x1c7   : > { %v651_v19 = vpop.f32.mrb[2].mxu1 }
 0x1c8   : > { %v654_v20 = vmax.f32 %v649_v17, 0.0  ;;  %v1083_v21 = vpop.f32.mrb[3].mxu1 }
 0x1ca   : > { %v655_v22 = vpack.c.bf16 %v654_v20, %v654_v20 }
 0x1cc   : > { %1093 = vmatmul.mubr.msk.bf16.vlgmr.msra.gmra.mrb[4].mxu0 %vm688_vm4, %v655_v22 }
 0x29f   : > { %v726_v23 = vpop.f32.mrb[4].mxu0 }
 0x2a0   : > { %735 = vst.msk [vmem:[#allocation3] sm:$0xff] %vm610_vm3, %v726_v23  ;;  %v1094_v24 = vpop.f32.mrb[5].mxu0 }
 0x2a1   : > { %v729_v25 = vpop.f32.mrb[6].mxu0 }
 0x2a2   : > { %v1095_v26 = vpop.f32.mrb[7].mxu0 }
 0x2a7   : > { %v746_v28 = vld [vmem:[#allocation3] sm:$0xff] }
 0x2a8   : > { %v754_v29 = vadd.f32 %v1047_v27, %v746_v28 }
 0x2aa   : > { %v755_v30 = vpack.c.bf16 %v754_v29, %v754_v29 }
 0x2ac   : > { %v778_v31 = vsel %vm776_vm5, %v755_v30, 0 }
 0x2ad   : > { %1097 = vmatpush3.bf16.msra.mxu1 %v778_v31 }
 0x2b0   : > { %1099 = vmatmul.mubr.msk.bf16.vlgmr.msra.gmra.mrb[4].mxu1 %vm772_vm6, %v764_v32 }
 0x380   : > { %824 = sbr.rel (%p1049_p5) target bundleno = 903 (0x387), region = 68 }
 0x383   : > { %v814_v33 = vpop.f32.mrb[4].mxu1 }
 0x384   : > { %v1100_v34 = vpop.f32.mrb[5].mxu1  ;;  %825 = vst.msk [vmem:[#allocation4] sm:$0xff] (!%p1049_p5), %vm610_vm3, %v814_v33 }
 0x385   : > { %v817_v35 = vpop.f32.mrb[6].mxu1 }
 0x386   : > { %v1101_v36 = vpop.f32.mrb[7].mxu1  ;;  %826 = vst.msk [vmem:[#allocation4 + $0x8] sm:$0xff] (!%p1049_p5), %vm610_vm3, %v817_v35 }
 0x387 PF: > { %p1050_p6 = scmp.le.s32.totalorder %s1191_s24, 0 }
 0x389   : > { %830 = sbr.rel (%p1050_p6) target bundleno = 913 (0x391), region = 72 }
 0x38b   : > { %v831_v37 = vld [vmem:[#allocation4] sm:$0xff] (!%p1050_p6) }
 0x38c   : > { %v833_v39 = vadd.f32 (!%p1050_p6), %v831_v37, %v814_v33 }
 0x38d   : > { %v832_v38 = vld [vmem:[#allocation4 + $0x8] sm:$0xff] (!%p1050_p6) }
 0x38e   : > { %v834_v40 = vadd.f32 (!%p1050_p6), %v832_v38, %v817_v35  ;;  %835 = vst.msk [vmem:[#allocation4] sm:$0xff] (!%p1050_p6), %vm610_vm3, %v833_v39 }
 0x390   : > { %836 = vst.msk [vmem:[#allocation4 + $0x8] sm:$0xff] %vm610_vm3, %v834_v40 }
 0x391 PF: > { %p1051_p7 = scmp.ne.s32.totalorder %s1191_s24, 3 }
 0x392   : > { %v841_v41 = vld [vmem:[%s1355_s2] sm:$0xff] (!%p1051_p7)  ;;  %v1203_v42 = vmov (!%p1051_p7), 0   ;;  %v842_v43 = vld [vmem:[%s1355_s2 + $0x8] sm:$0xff] (!%p1051_p7) }
 0x393   : > { %840 = sbr.rel (%p1051_p7) target bundleno = 1051 (0x41b), region = 76  ;;  %1146 = vset.pattern.permute.xlu0 (!%p1051_p7), %v1203_v42 }
 0x394   : > { %847 = vperm.xlu0 (!%p1051_p7), %1146, %v841_v41  }
 0x396   : > { %v843_v44 = vld [vmem:[#allocation4] sm:$0xff] (!%p1051_p7) }
 0x397   : > { %v844_v47 = vld [vmem:[#allocation4 + $0x8] sm:$0xff] (!%p1051_p7) }
 0x398   : > { %852 = vperm.xlu0 (!%p1051_p7), %1146, %v842_v43  }
 0x413   : > { %v848_v45 = vpop.permute.xlu0 %847 }
 0x414   : > { %v855_v46 = vmul.f32 %v848_v45, %v843_v44 }
 0x416   : > { %857 = vst.msk [vmem:[#allocation5] sm:$0xff] %vm610_vm3, %v855_v46 }
 0x417   : > { %v853_v48 = vpop.permute.xlu0 %852 }
 0x418   : > { %v856_v49 = vmul.f32 %v853_v48, %v844_v47 }
 0x41a   : > { %858 = vst.msk [vmem:[#allocation5 + $0x8] sm:$0xff] %vm610_vm3, %v856_v49 }
 0x41b PF: > { %p1318_p8 = scmp.eq.s32.totalorder %s1025_s27, 3  ;;  %s1204_s13 = smov [#allocation5]  }
 0x41c   : > { %s870_s14 = sshll.u32 %s1204_s13, 4  ;;  %s871_s14 = int_to_ptr.vmem [resolvable:$true] %s870_s14 }
 0x41d   : > { %s1147_s15 = scalar_lea.vmem %s871_s14, 256  ;;  %p1154_p12 = scmp.lt.s32.totalorder %s871_s14, %s871_s14 }
 0x41e   : > { %p1148_p9 = scmp.ne.s32.totalorder %s871_s14, %s1147_s15  ;;  %p1155_p13 = scmp.lt.s32.totalorder %s1147_s15, %s1147_s15 }
 0x420   : > { %p1149_p10 = pnand %p1148_p9, %p1318_p8  ;;  %p1156_p0 = por %p1155_p13, %p1154_p12 }
 0x422   : > { %p1150_p11 = pneg %p1149_p10 }
 0x424   : > { %p1157_p1 = pnand %p1156_p0, %p1150_p11 }
 0x426   : > { %1160 = shalt.err (!%p1157_p1)
}
 0x427   : > { %s1161_s27 = scalar_lea.hbm %s1360_s7, 256 }
 0x428   : > { %p1162_p2 = scmp.ne.s32.totalorder %s1360_s7, %s1161_s27  ;;  %p1167_p5 = scmp.lt.u32.totalorder %s1161_s27, %s1360_s7 }
 0x42a   : > { %p1163_p3 = pnand %p1162_p2, %p1318_p8 }
 0x42c   : > { %p1164_p4 = pneg %p1163_p3 }
 0x42e   : > { %p1169_p6 = pnand %p1167_p5, %p1164_p4 }
 0x430   : > { %1172 = shalt.err (!%p1169_p6)
}
 0x431   : > { %s1205_s22 = smov 128   ;;  %s1206_s23 = smov 8  }
 0x432   : > { %1103 = dma.vmem_to_hbm [thread:$0]  (%p1318_p8), %s871_s14, 256, %s1360_s7, [#allocation6], %s1205_s22, %s1205_s22, %s1206_s23  }
 0x433   : > { %1186 = dma.done.wait (%p1318_p8), [#allocation6], 256  }
 0x434   : > { %1188 = vsyncadd (%p1318_p8), [#allocation6], 4294967040 }
 0x435 PF: > { %s18_s26 = sadd.s32 1, %s1199_s26   ;;  %s1362_s24 = smov %s1195_s25 }
 0x436   : > { %p15_p7 = scmp.ge.s32.totalorder %s18_s26, 6   ;;  %s1363_s25 = smov %s1365_s28 }
 0x438   :  { %17 = sbr.rel (!%p15_p7) target bundleno = 2 (0x2), region = 122 }
 0x43f   :  { %886 = vsyncpa [#allocation6], 1 }
 0x440   :  { %888 = vsyncpa [#allocation6 + $0x1], 1 }

</bundles_post_ra>
